<compile_context>
chip_gen: v6e
topology: v6e:2x2x1
jax: 0.10.0
libtpu: 0.0.40
codegen_flags: <defaults>
</compile_context>

<pallas_src>
import math
from functools import partial

import jax
import jax.numpy as jnp
from jax.experimental import pallas as pl
from jax.experimental.pallas import tpu as pltpu


# --------------------------------------------------------------------------
# VMEM budget (generation aware)
# --------------------------------------------------------------------------
def _vmem_budget_bytes() -> int:
    cap = 128 * 1024 * 1024
    try:
        info = pltpu.get_tpu_info()
        cap = int(getattr(info, "vmem_capacity_bytes", cap))
    except Exception:
        pass
    # v7x-class chips only have 64 MiB of VMEM per TensorCore -> tighter budget.
    return (40 << 20) if cap <= (64 << 20) else (48 << 20)


def _pick_hw_tile(hw_pad: int, c: int, itemsize: int, budget: int,
                  n_streams: int, cap_t=None) -> int:
    """Largest multiple-of-128 divisor of hw_pad whose double-buffered
    footprint (n_streams arrays of (1, C, T) plus value-temp headroom) fits
    the VMEM budget."""
    q = hw_pad // 128
    denom = max(1, (2 * n_streams + 2) * c * itemsize)   # 2x buffers + temps
    max_m = max(1, (int(0.9 * budget) // denom) // 128)
    if cap_t is not None:
        max_m = max(1, min(max_m, max(1, cap_t // 128)))
    m = min(q, max_m)
    while m > 1 and q % m:
        m -= 1
    return m * 128


# --------------------------------------------------------------------------
# Fused single-pass kernel: pool -> conv -> sigmoid -> scale
# --------------------------------------------------------------------------
def _make_fused_kernel(k: int, c: int, hw: int):
    pad = (k - 1) // 2
    inv_hw = 1.0 / float(hw)

    def kernel(w_ref, x_ref, o_ref):
        # w_ref: (k,) f32 SMEM ; x_ref/o_ref: (1, C, HW) per-batch slab.
        x = x_ref[...]
        # Global average pool with f32 accumulation -> (1, C), C on lanes.
        y = jnp.sum(x.astype(jnp.float32), axis=2) * inv_hw
        # Fused zero-padded k-tap channel conv + lane->sublane transpose via a
        # banded mask-reduce (all VPU/reduce ops; avoids a minor-dim reshape).
        # TODO(synk): replace with a plain (1,C)->(C,1) relayout once that
        # reshape is guaranteed by the Mosaic lowering (saves the C*C temps).
        ci = jax.lax.broadcasted_iota(jnp.int32, (1, c, c), 1)   # out channel
        cj = jax.lax.broadcasted_iota(jnp.int32, (1, c, c), 2)   # in channel
        d = cj - ci + pad
        band = w_ref[0] * (d == 0).astype(jnp.float32)
        for m in range(1, k):                                     # k tiny & static
            band = band + w_ref[m] * (d == m).astype(jnp.float32)
        y_b = jax.lax.broadcast_in_dim(y, (1, c, c), (0, 2))
        conv = jnp.sum(band * y_b, axis=2, keepdims=True)         # (1, C, 1)
        gate = jax.nn.sigmoid(conv).astype(o_ref.dtype)           # cast once
        o_ref[...] = x * gate

    return kernel


# --------------------------------------------------------------------------
# Two-pass fallback: pass 1 = tiled spatial partial sums (C on sublanes)
# --------------------------------------------------------------------------
def _sum_kernel(x_ref, psum_ref, acc_ref):
    # x_ref: (1, C, T) ; psum_ref: (1, 1, C, 1) f32 ; acc_ref: (1, C, 1) f32
    t = pl.program_id(2)

    @pl.when(t == 0)
    def _():
        acc_ref[...] = jnp.zeros_like(acc_ref)

    acc_ref[...] += jnp.sum(x_ref[...].astype(jnp.float32), axis=2,
                            keepdims=True)

    @pl.when(t == pl.num_programs(2) - 1)
    def _():
        psum_ref[...] = acc_ref[...][None]        # (1,C,1) -> (1,1,C,1)


# --------------------------------------------------------------------------
# Two-pass fallback: pass 2 = lane-dense broadcast multiply out = x * gate
# --------------------------------------------------------------------------
def _scale_kernel(g_ref, x_ref, o_ref):
    # g_ref: (1, C, 1) in x.dtype ; x_ref/o_ref: (1, C, T)
    o_ref[...] = x_ref[...] * g_ref[...]


# --------------------------------------------------------------------------
# Wrapper
# --------------------------------------------------------------------------
@partial(jax.jit,
         static_argnames=("alias_output_to_x", "force_two_pass", "max_hw_tile"))
def eca_block_pallas(x: jax.Array, conv_weight: jax.Array,
                     alias_output_to_x: bool = False,
                     force_two_pass: bool = False,
                     max_hw_tile=None) -> jax.Array:
    """x: (B, C, H, W); conv_weight: (k,).

    alias_output_to_x=True writes the result in place (only useful when the
    caller donates x; otherwise XLA inserts a defensive copy).
    force_two_pass / max_hw_tile are test hooks for the fallback path.
    """
    B, C, H, W = x.shape
    HW = H * W
    k = int(conv_weight.shape[0])
    pad = (k - 1) // 2
    itemsize = jnp.dtype(x.dtype).itemsize

    w_f32 = conv_weight.astype(jnp.float32)      # explicit weight precision
    budget = _vmem_budget_bytes()
    x_flat = x.reshape(B, C, HW)

    # ---- Fused single-pass path --------------------------------------------
    slab = C * HW * itemsize
    slab_f32 = C * HW * 4
    # Conservative estimate: 2x double-buffered in+out blocks, value temps
    # (loaded slab / f32 sum path / product), and the C*C band temporaries.
    fused_need = 6 * slab + 2 * slab_f32 + 8 * C * C * 4
    if (not force_two_pass) and fused_need <= int(0.95 * budget):
        out_flat = pl.pallas_call(
            _make_fused_kernel(k, C, HW),
            out_shape=jax.ShapeDtypeStruct((B, C, HW), x.dtype),
            grid=(B,),
            in_specs=[
                pl.BlockSpec(memory_space=pltpu.MemorySpace.SMEM),   # weights
                pl.BlockSpec((1, C, HW), lambda b: (b, 0, 0)),       # x slab
            ],
            out_specs=pl.BlockSpec((1, C, HW), lambda b: (b, 0, 0)),
            compiler_params=pltpu.CompilerParams(
                dimension_semantics=("parallel",),
                vmem_limit_bytes=budget),
            input_output_aliases={1: 0} if alias_output_to_x else {},
            cost_estimate=pl.CostEstimate(
                flops=2 * B * C * HW + 2 * B * k * C * C,
                transcendentals=B * C,
                bytes_accessed=2 * B * C * HW * itemsize + k * 4),
        )(w_f32, x_flat)
        return out_flat.reshape(B, C, H, W)

    # ---- Two-pass fallback ---------------------------------------------------
    # Keep every store lane-dense: pad HW up to a multiple of 128 if needed.
    if HW % 128 != 0:
        HW_pad = ((HW + 127) // 128) * 128
        x_flat = jnp.pad(x_flat, ((0, 0), (0, 0), (0, HW_pad - HW)))
    else:
        HW_pad = HW

    # Pass 1: partial spatial sums, with an S-way "parallel" HW split so both
    # v7x TensorCores stream HBM even at B == 1 (harmless on v5e/v6e).
    T1 = _pick_hw_tile(HW_pad, C, itemsize, budget, n_streams=1, cap_t=max_hw_tile)
    n_hw1 = HW_pad // T1
    S = 2 if (n_hw1 >= 2 and n_hw1 % 2 == 0) else 1
    n_sub = n_hw1 // S
    limit1 = max(budget, 4 * C * T1 * itemsize + (4 << 20))
    # TODO(synk): if profiling shows the per-(b,s) epilogue exposing the next
    # DMA, add pipeline_mode=pl.Buffered(3) on the x BlockSpec below.

    psum = pl.pallas_call(
        _sum_kernel,
        out_shape=jax.ShapeDtypeStruct((B, S, C, 1), jnp.float32),
        grid=(B, S, n_sub),
        in_specs=[pl.BlockSpec((1, C, T1),
                               lambda b, s, t: (b, 0, s * n_sub + t))],
        out_specs=pl.BlockSpec((1, 1, C, 1), lambda b, s, t: (b, s, 0, 0)),
        scratch_shapes=[pltpu.VMEM((1, C, 1), jnp.float32)],
        compiler_params=pltpu.CompilerParams(
            dimension_semantics=("parallel", "parallel", "arbitrary"),
            vmem_limit_bytes=limit1),
        cost_estimate=pl.CostEstimate(
            flops=B * C * HW_pad,
            transcendentals=0,
            bytes_accessed=B * C * HW_pad * itemsize + B * S * C * 4),
    )(x_flat)

    # Tiny epilogue on B*C scalars in plain JAX: mean -> conv -> sigmoid.
    y = jnp.sum(psum, axis=1)[:, :, 0] * (1.0 / HW)          # true-HW mean
    y_padc = jnp.pad(y, ((0, 0), (pad, pad)))
    conv = sum(w_f32[j] * y_padc[:, j:j + C] for j in range(k))
    gate = jax.nn.sigmoid(conv).astype(x.dtype)[:, :, None]   # (B, C, 1)

    # Pass 2: lane-dense broadcast multiply.
    T2 = _pick_hw_tile(HW_pad, C, itemsize, budget, n_streams=2, cap_t=max_hw_tile)
    n_hw2 = HW_pad // T2
    limit2 = max(budget, 6 * C * T2 * itemsize + (4 << 20))

    out_flat = pl.pallas_call(
        _scale_kernel,
        out_shape=jax.ShapeDtypeStruct((B, C, HW_pad), x.dtype),
        grid=(B, n_hw2),
        in_specs=[
            pl.BlockSpec((1, C, 1), lambda b, t: (b, 0, 0)),     # gate
            pl.BlockSpec((1, C, T2), lambda b, t: (b, 0, t)),    # x tile
        ],
        out_specs=pl.BlockSpec((1, C, T2), lambda b, t: (b, 0, t)),
        compiler_params=pltpu.CompilerParams(
            dimension_semantics=("parallel", "parallel"),
            vmem_limit_bytes=limit2),
        input_output_aliases={1: 0} if alias_output_to_x else {},
        cost_estimate=pl.CostEstimate(
            flops=B * C * HW_pad,
            transcendentals=0,
            bytes_accessed=2 * B * C * HW_pad * itemsize + B * C * itemsize),
    )(gate, x_flat)

    return out_flat[:, :, :HW].reshape(B, C, H, W)


# --------------------------------------------------------------------------
# Pure-JAX reference mirroring the PyTorch forward
# --------------------------------------------------------------------------
def eca_block_reference(x: jax.Array, conv_weight: jax.Array) -> jax.Array:
    B, C, H, W = x.shape
    k = int(conv_weight.shape[0])
    pad = (k - 1) // 2
    y = jnp.mean(x, axis=(2, 3))                          # (B, C)
    y_pad = jnp.pad(y, ((0, 0), (pad, pad)))              # (B, C + 2*pad)
    conv = sum(conv_weight[j] * y_pad[:, j:j + C] for j in range(k))
    gate = jax.nn.sigmoid(conv)                           # (B, C)
    return x * gate[:, :, None, None]


if __name__ == "__main__":
    # batch=2, channels=16, spatial=16x16.
    # kernel_size from the module: int(abs((log2(16)+1)/2)) = 2 -> even -> 3
    B, C, H, W = 2, 16, 16, 16
    b_const, gamma = 1, 2
    k = int(abs((math.log(C, 2) + b_const) / gamma))
    k = k if k % 2 else k + 1

    key = jax.random.PRNGKey(0)
    kx, kw = jax.random.split(key)
    x = jax.random.normal(kx, (B, C, H, W), dtype=jnp.float32)

    # Deterministic Conv1d(1, 1, k, bias=False) weight init
    # (PyTorch default: U(-1/sqrt(fan_in), 1/sqrt(fan_in)), fan_in = k).
    bound = 1.0 / math.sqrt(k)
    conv_weight = jax.random.uniform(
        kw, (k,), minval=-bound, maxval=bound, dtype=jnp.float32)

    # 1) Fused single-pass path (typical: per-batch slab fits VMEM).
    ref = eca_block_reference(x, conv_weight)
    out = jax.block_until_ready(eca_block_pallas(x, conv_weight))
    assert out.shape == x.shape
    assert jnp.allclose(out, ref, atol=1e-5, rtol=1e-5), "fused path mismatch"

    # 2) Two-pass fallback, forced: multiple HW tiles + S=2 parallel split.
    x2 = jax.random.normal(kx, (2, 16, 32, 32), dtype=jnp.float32)
    ref2 = eca_block_reference(x2, conv_weight)
    out2 = jax.block_until_ready(
        eca_block_pallas(x2, conv_weight, force_two_pass=True, max_hw_tile=256))
    assert jnp.allclose(out2, ref2, atol=1e-5, rtol=1e-5), "two-pass mismatch"

    # 3) Two-pass fallback with HW not a multiple of 128 (padding path).
    x3 = jax.random.normal(kw, (2, 16, 12, 12), dtype=jnp.float32)
    ref3 = eca_block_reference(x3, conv_weight)
    out3 = jax.block_until_ready(
        eca_block_pallas(x3, conv_weight, force_two_pass=True, max_hw_tile=128))
    assert jnp.allclose(out3, ref3, atol=1e-5, rtol=1e-5), "padded path mismatch"

    print("KERNEL_OK")
</pallas_src>

<mosaic_0001>
module attributes {stable_mosaic.version = 11 : i64} {
  func.func @kernel(%arg0: i32, %arg1: memref<3xf32, #tpu.memory_space<smem>>, %arg2: memref<1x16x256xf32, #tpu.memory_space<vmem>>, %arg3: memref<1x16x256xf32, #tpu.memory_space<vmem>>) attributes {dimension_semantics = [#tpu.dimension_semantics<parallel>], iteration_bounds = array<i64: 2>, scalar_prefetch = 0 : i64, scratch_operands = 0 : i64, tpu.core_type = #tpu.core_type<tc>, window_params = [{transform_indices = @transform_0, window_bounds = array<i64: 3>}, {transform_indices = @transform_1, window_bounds = array<i64: 1, 16, 256>}, {transform_indices = @transform_2, window_bounds = array<i64: 1, 16, 256>}]} {
    %c0 = arith.constant 0 : index
    %c0_0 = arith.constant 0 : index
    %c0_1 = arith.constant 0 : index
    %0 = vector.load %arg2[%c0, %c0_0, %c0_1] : memref<1x16x256xf32, #tpu.memory_space<vmem>>, vector<1x16x256xf32>
    %cst = arith.constant dense<0.000000e+00> : vector<1x16xf32>
    %1 = vector.multi_reduction <add>, %0, %cst [2] : vector<1x16x256xf32> to vector<1x16xf32>
    %cst_2 = arith.constant 3.906250e-03 : f32
    %2 = vector.broadcast %cst_2 : f32 to vector<1x16xf32>
    %3 = arith.mulf %1, %2 : vector<1x16xf32>
    %4 = tpu.iota {dimensions = array<i32: 1>} : vector<1x16x16xi32>
    %5 = tpu.iota {dimensions = array<i32: 2>} : vector<1x16x16xi32>
    %6 = arith.subi %5, %4 : vector<1x16x16xi32>
    %c1_i32 = arith.constant 1 : i32
    %7 = vector.broadcast %c1_i32 : i32 to vector<1x16x16xi32>
    %8 = arith.addi %6, %7 : vector<1x16x16xi32>
    %c0_3 = arith.constant 0 : index
    %9 = memref.load %arg1[%c0_3] : memref<3xf32, #tpu.memory_space<smem>>
    %c0_i32 = arith.constant 0 : i32
    %10 = vector.broadcast %c0_i32 : i32 to vector<1x16x16xi32>
    %11 = arith.cmpi eq, %8, %10 : vector<1x16x16xi32>
    %12 = arith.extui %11 : vector<1x16x16xi1> to vector<1x16x16xi32>
    %13 = arith.sitofp %12 : vector<1x16x16xi32> to vector<1x16x16xf32>
    %14 = vector.broadcast %9 : f32 to vector<1x16x16xf32>
    %15 = arith.mulf %14, %13 : vector<1x16x16xf32>
    %c1 = arith.constant 1 : index
    %16 = memref.load %arg1[%c1] : memref<3xf32, #tpu.memory_space<smem>>
    %c1_i32_4 = arith.constant 1 : i32
    %17 = vector.broadcast %c1_i32_4 : i32 to vector<1x16x16xi32>
    %18 = arith.cmpi eq, %8, %17 : vector<1x16x16xi32>
    %19 = arith.extui %18 : vector<1x16x16xi1> to vector<1x16x16xi32>
    %20 = arith.sitofp %19 : vector<1x16x16xi32> to vector<1x16x16xf32>
    %21 = vector.broadcast %16 : f32 to vector<1x16x16xf32>
    %22 = arith.mulf %21, %20 : vector<1x16x16xf32>
    %23 = arith.addf %15, %22 : vector<1x16x16xf32>
    %c2 = arith.constant 2 : index
    %24 = memref.load %arg1[%c2] : memref<3xf32, #tpu.memory_space<smem>>
    %c2_i32 = arith.constant 2 : i32
    %25 = vector.broadcast %c2_i32 : i32 to vector<1x16x16xi32>
    %26 = arith.cmpi eq, %8, %25 : vector<1x16x16xi32>
    %27 = arith.extui %26 : vector<1x16x16xi1> to vector<1x16x16xi32>
    %28 = arith.sitofp %27 : vector<1x16x16xi32> to vector<1x16x16xf32>
    %29 = vector.broadcast %24 : f32 to vector<1x16x16xf32>
    %30 = arith.mulf %29, %28 : vector<1x16x16xf32>
    %31 = arith.addf %23, %30 : vector<1x16x16xf32>
    %32 = vector.shape_cast %3 : vector<1x16xf32> to vector<1x1x16xf32>
    %33 = vector.broadcast %32 : vector<1x1x16xf32> to vector<1x16x16xf32>
    %34 = arith.mulf %31, %33 : vector<1x16x16xf32>
    %cst_5 = arith.constant dense<0.000000e+00> : vector<1x16xf32>
    %35 = vector.multi_reduction <add>, %34, %cst_5 [2] : vector<1x16x16xf32> to vector<1x16xf32>
    %36 = vector.shape_cast %35 : vector<1x16xf32> to vector<1x16x1xf32>
    %37 = arith.negf %36 : vector<1x16x1xf32>
    %38 = math.exp %37 : vector<1x16x1xf32>
    %cst_6 = arith.constant 1.000000e+00 : f32
    %39 = vector.broadcast %cst_6 : f32 to vector<1x16x1xf32>
    %40 = arith.addf %39, %38 : vector<1x16x1xf32>
    %41 = arith.divf %39, %40 : vector<1x16x1xf32>
    %42 = vector.broadcast %41 : vector<1x16x1xf32> to vector<1x16x256xf32>
    %43 = arith.mulf %0, %42 : vector<1x16x256xf32>
    %c0_7 = arith.constant 0 : index
    %c0_8 = arith.constant 0 : index
    %c0_9 = arith.constant 0 : index
    %44 = vector.load %arg3[%c0_7, %c0_8, %c0_9] : memref<1x16x256xf32, #tpu.memory_space<vmem>>, vector<1x16x256xf32>
    tpu.vector_store %arg3[%c0_7, %c0_8, %c0_9], %43 {strides = array<i32>} : memref<1x16x256xf32, #tpu.memory_space<vmem>>, vector<1x16x256xf32>,
    return
  }
  func.func @transform_0(%arg0: i32) -> i32 {
    %c0_i32 = arith.constant 0 : i32
    %c0_i32_0 = arith.constant 0 : i32
    return %c0_i32 : i32
  }
  func.func @transform_1(%arg0: i32) -> (i32, i32, i32) {
    %c0_i32 = arith.constant 0 : i32
    %c0_i32_0 = arith.constant 0 : i32
    %c0_i32_1 = arith.constant 0 : i32
    return %arg0, %c0_i32, %c0_i32_0 : i32, i32, i32
  }
  func.func @transform_2(%arg0: i32) -> (i32, i32, i32) {
    %c0_i32 = arith.constant 0 : i32
    %c0_i32_0 = arith.constant 0 : i32
    %c0_i32_1 = arith.constant 0 : i32
    return %arg0, %c0_i32, %c0_i32_0 : i32, i32, i32
  }
}

</mosaic_0001>

<bundles_post_ra>
// kernel: eca_block_pallas.1
= control target key start
LH: loop header
LB: loop body
LE: loop exit
PB: predicated region body
PF: predicated region fallthrough
CT: control target
= control target key end

     0   :  { %7 = vsyncpa [#allocation3], 0  ;;  %s432_s9 = smov 0   ;;  %s486_s0 = inlined_call_operand.vmem [shape: f32[3], index: 0, kind: input, shape index: {}]   ;;  %s487_s1 = inlined_call_operand.vmem [shape: f32[2,16,256], index: 1, kind: input, shape index: {}]   ;;  %s488_s2 = inlined_call_operand.vmem [shape: f32[2,16,256], index: 2, kind: output, shape index: {}]  }
   0x1 LB: > { %s335_s10 = sadd.s32 4294967295, %s413_s9   ;;  %p337_p0 = scmp.ge.s32.totalorder %s413_s9, 1  ;;  %s413_s9 = sphi %s432_s9, %s13_s9  }
   0x2   : > { %p91_p1 = scmp.lt.s32.totalorder %s413_s9, 3  ;;  %s104_s13 = sshll.u32 %s486_s0, 4  ;;  %s105_s13 = int_to_ptr.vmem [resolvable:$true] %s104_s13 }
   0x3   : > { %p368_p3 = scmp.eq.s32.totalorder %s335_s10, 0  ;;  %s388_s15 = scalar_lea.vmem %s105_s13, 16 }
   0x4   : > { %p443_p2 = pnand %p337_p0, %p91_p1  ;;  %p389_p6 = scmp.ne.s32.totalorder %s105_s13, %s388_s15 }
   0x5   : > { %p396_p10 = scmp.lt.s32.totalorder %s105_s13, %s105_s13  ;;  %p397_p11 = scmp.lt.s32.totalorder %s388_s15, %s388_s15 }
   0x6   : > { %p364_p4 = pneg %p443_p2 }
   0x7   : > { %p398_p12 = por %p397_p11, %p396_p10 }
   0x8   : > { %p365_p5 = pnand %p368_p3, %p364_p4 }
   0xa   : > { %p390_p7 = pneg %p365_p5 }
   0xc   : > { %p391_p8 = pnand %p390_p7, %p389_p6 }
   0xe   : > { %p392_p9 = pneg %p391_p8 }
  0x10   : > { %p399_p13 = pnand %p398_p12, %p392_p9 }
  0x12   : > { %402 = shalt.err (!%p399_p13)
}
  0x13   : > { %s415_s16 = smov [#allocation2]   ;;  %125 = sbr.rel (%p443_p2) target bundleno = 362 (0x16a), region = 28 }
  0x14   : > { %367 = dma.vmem_to_smem (!%p365_p5), %s105_s13, 16, %s415_s16, [#allocation3]  }
  0x18   : > { %408 = dma.done.wait (%p368_p3), [#allocation3], 16  }
  0x19   : > { %410 = vsyncadd (%p368_p3), [#allocation3], 4294967280 }
  0x1a   : > { %131 = sfence }
  0x1b   : > { %p148_p0 = scmp.lt.s32.totalorder %s335_s10, 1  ;;  %v170_v6 = vlaneseq  ;;  %s179_s21 = sld [smem:[#allocation2]]  ;;  %v416_v14 = vmov 0.0   ;;  %vm224_vm6 = vcmask 130112   ;;  %vm241_vm7 = vcmask 130048  }
  0x1c   : > { %s348_s22 = sld [smem:[#allocation2 + $0x1]] }
  0x1d   : > { %s491_s10 = smov (!%p148_p0, %s335_s10), 1  ;;  %v171_v7 = vshrl.u32 %v170_v6, 7  ;;  %v174_v8 = vand.u32 127, %v170_v6  ;;  %s351_s23 = sld [smem:[#allocation2 + $0x2]] }
  0x1e   : > { %s358_s17 = sshll.u32 %s491_s10, 5 }
  0x1f   : > { %s152_s20 = scalar_lea.vmem %s487_s1, %s358_s17  ;;  %v172_v9 = vadd.s32 8, %v171_v7  ;;  %v175_v10 = vsub.s32 %v174_v8, %v171_v7  ;;  %v219_v23 = vadd.s32 4294967288, %v174_v8  ;;  %s157_s26 = scalar_lea.vmem %s488_s2, %s358_s17 }
  0x20   : > { %v462_v0 = vld [vmem:[%s152_s20] sm:$0xff]  ;;  %v464_v1 = vld [vmem:[%s152_s20 + $0x8] sm:$0xff]  ;;  %v466_v2 = vld [vmem:[%s152_s20 + $0x10] sm:$0xff] }
  0x21   : > { %v162_v3 = vadd.f32 %v464_v1, %v462_v0  ;;  %v470_v4 = vld [vmem:[%s152_s20 + $0x18] sm:$0xff]  ;;  %v176_v11 = vsub.s32 %v174_v8, %v172_v9  ;;  %v177_v12 = vadd.s32 1, %v175_v10  ;;  %v186_v16 = vstv %s179_s21 }
  0x22   : > { %v165_v5 = vadd.f32 %v470_v4, %v466_v2  ;;  %v196_v18 = vstv %s348_s22  ;;  %v222_v33 = vsub.s32 %v219_v23, %v171_v7 }
  0x23   : > { %163 = vadd.xlane.f32.xlu0 %v162_v3  ;;  %v178_v13 = vadd.s32 1, %v176_v11  ;;  %vm180_vm0 = vcmp.eq.s32.totalorder %v177_v12, 0  ;;  %vm190_vm1 = vcmp.eq.s32.totalorder %v177_v12, 1  ;;  %vm202_vm4 = vcmp.eq.s32.totalorder %v177_v12, 2 }
  0x24   : > { %v346_v15 = vsel %vm180_vm0, 1.0, %v416_v14  ;;  %v349_v17 = vsel %vm190_vm1, 1.0, %v416_v14  ;;  %v352_v24 = vsel %vm202_vm4, 1.0, %v416_v14  ;;  %v208_v25 = vstv %s351_s23 }
  0x25   : > { %vm181_vm2 = vcmp.eq.s32.totalorder %v178_v13, 0  ;;  %vm191_vm3 = vcmp.eq.s32.totalorder %v178_v13, 1  ;;  %v187_v21 = vmul.f32 %v346_v15, %v186_v16  ;;  %v197_v22 = vmul.f32 %v349_v17, %v196_v18 }
  0x26   : > { %v347_v19 = vsel %vm181_vm2, 1.0, %v416_v14  ;;  %v350_v20 = vsel %vm191_vm3, 1.0, %v416_v14  ;;  %vm203_vm5 = vcmp.eq.s32.totalorder %v178_v13, 2  ;;  %v209_v31 = vmul.f32 %v352_v24, %v208_v25 }
  0x27   : > { %166 = vadd.xlane.f32.xlu0 %v165_v5  ;;  %v188_v27 = vmul.f32 %v347_v19, %v186_v16  ;;  %v198_v28 = vmul.f32 %v350_v20, %v196_v18  ;;  %v353_v29 = vsel %vm203_vm5, 1.0, %v416_v14  ;;  %v199_v30 = vadd.f32 %v197_v22, %v187_v21 }
  0x28   : > { %v210_v36 = vmul.f32 %v353_v29, %v208_v25 }
  0x29   : > { %v200_v35 = vadd.f32 %v198_v28, %v188_v27  ;;  %v211_v38 = vadd.f32 %v209_v31, %v199_v30 }
  0x2b   : > { %v212_v41 = vadd.f32 %v210_v36, %v200_v35 }
  0xac   : > { %v164_v26 = vpop.xlane.xlu0 %163 }
  0xad   : > { %v168_v32 = vmul.f32 0.00390625, %v164_v26 }
  0xaf   : > { %v218_v39 = vrot.slane %v168_v32, %v175_v10 }
  0xb0   : > { %v167_v34 = vpop.xlane.xlu0 %166 }
  0xb1   : > { %v169_v37 = vmul.f32 0.00390625, %v167_v34 }
  0xb3   : > { %v223_v40 = vrot.slane %v169_v37, %v222_v33 }
  0xb5   : > { %v225_v42 = vsel %vm224_vm6, %v223_v40, %v218_v39 }
  0xb6   : > { %v239_v43 = vmul.f32 %v225_v42, %v211_v38  ;;  %v240_v45 = vmul.f32 %v225_v42, %v212_v41 }
  0xb8   : > { %v242_v44 = vsel %vm241_vm7, %v239_v43, 0.0  ;;  %v245_v46 = vsel %vm241_vm7, %v240_v45, 0.0 }
  0xb9   : > { %243 = vadd.xlane.f32.xlu1 %v242_v44 }
  0xbd   : > { %246 = vadd.xlane.f32.xlu1 %v245_v46 }
 0x142   : > { %v244_v47 = vpop.xlane.xlu1 %243 }
 0x143   : > { %v354_v48 = vmul.f32 -1.442695, %v244_v47 }
 0x145   : > { %380 = vpow2.f32 %v354_v48 }
 0x146   : > { %v247_v49 = vpop.xlane.xlu1 %246 }
 0x147   : > { %v355_v50 = vmul.f32 -1.442695, %v247_v49 }
 0x149   : > { %382 = vpow2.f32 %v355_v50 }
 0x152   : > { %v381_v51 = vpop.eup %380 }
 0x153   : > { %v254_v52 = vadd.f32 1.0, %v381_v51 }
 0x155   : > { %384 = vrcp.f32 %v254_v52 }
 0x156   : > { %v383_v53 = vpop.eup %382 }
 0x157   : > { %v255_v54 = vadd.f32 1.0, %v383_v53 }
 0x159   : > { %386 = vrcp.f32 %v255_v54 }
 0x162   : > { %v385_v55 = vpop.eup %384 }
 0x163   : > { %v260_v56 = vmul.f32 %v385_v55, %v462_v0  ;;  %v261_v57 = vmul.f32 %v385_v55, %v464_v1 }
 0x165   : > { %264 = vst [vmem:[%s157_s26] sm:$0xff] %v260_v56  ;;  %265 = vst [vmem:[%s157_s26 + $0x8] sm:$0xff] %v261_v57 }
 0x166   : > { %v387_v58 = vpop.eup %386 }
 0x167   : > { %v262_v59 = vmul.f32 %v387_v58, %v466_v2  ;;  %v263_v60 = vmul.f32 %v387_v58, %v470_v4 }
 0x169   : > { %266 = vst [vmem:[%s157_s26 + $0x10] sm:$0xff] %v262_v59  ;;  %267 = vst [vmem:[%s157_s26 + $0x18] sm:$0xff] %v263_v60 }
 0x16a PF: > { %s13_s9 = sadd.s32 1, %s413_s9  }
 0x16b   : > { %p10_p1 = scmp.ge.s32.totalorder %s13_s9, 4  }
 0x16d   :  { %12 = sbr.rel (!%p10_p1) target bundleno = 1 (0x1), region = 63 }
 0x172   :  { %289 = vsyncpa [#allocation3], 1 }
 0x173   :  { %291 = vsyncpa [#allocation3 + $0x1], 1 }

</bundles_post_ra>
